<compile_context>
chip_gen: v7x
topology: tpu7x:2x2x1
jax: 0.10.0
libtpu: 0.0.40
codegen_flags: <defaults>
</compile_context>

<pallas_src>
import jax
import jax.numpy as jnp
from jax.experimental import pallas as pl
from jax.experimental.pallas import tpu as pltpu

LANE = 128              # vreg lane width
SUB = 8                 # f32 sublane count (rows of the per-shard output block)
MAX_BLOCK_ROWS = 4096   # (4096,128) f32 block = 2 MiB; 2 inputs x 2 bufs = 8 MiB VMEM
NUM_SHARDS = 2          # leading "parallel" grid axis -> both TensorCores on v7x


def _make_sums_kernel(block_rows, n_rows, num_shards, bps, total_blocks, include_bce):
    """Partial-sum kernel over a (n_rows, LANE) slab tiled into (block_rows, LANE).

    Per-shard (SUB, LANE) f32 output block rows (per-lane partial sums):
      [0] intersection = sum((x > 0) * y)      (sigmoid(x) > 0.5  <=>  x > 0)
      [1] pred_sum     = sum(x > 0)
      [2] target_sum   = sum(y)
      [3] bce_sum      = sum(max(x,0) - x*y + log1p(exp(-|x|)))   (only if include_bce)
    Cross-lane and cross-shard reduction happens in the wrapper.
    """
    num_sums = 4 if include_bce else 3
    # True -> every (shard, inner) block is full and in-bounds: no mask code emitted.
    no_mask_ever = (total_blocks * block_rows == n_rows
                    and num_shards * bps == total_blocks)

    def kernel(x_ref, y_ref, out_ref, *accs):
        inner = pl.program_id(1)

        @pl.when(inner == 0)
        def _init():
            out_ref[...] = jnp.zeros_like(out_ref)
            for a in accs:
                a[...] = jnp.zeros_like(a)

        def accumulate(valid):
            y = y_ref[...].astype(jnp.float32)
            if include_bce:
                x = x_ref[...].astype(jnp.float32)
                pred_pos = x > 0.0
            else:
                pred_pos = x_ref[...] > 0          # native dtype: no f32 upcast of x
            if valid is not None:
                y = jnp.where(valid, y, 0.0)
                pred_pos = jnp.logical_and(valid, pred_pos)

            def fold(v):                           # (block_rows, LANE) -> (1, LANE)
                return jnp.sum(v, axis=0, keepdims=True)

            accs[0][...] += fold(jnp.where(pred_pos, y, 0.0))
            accs[1][...] += fold(pred_pos.astype(jnp.float32))
            accs[2][...] += fold(y)
            if include_bce:
                bce = jnp.maximum(x, 0.0) - x * y + jnp.log1p(jnp.exp(-jnp.abs(x)))
                if valid is not None:
                    bce = jnp.where(valid, bce, 0.0)
                accs[3][...] += fold(bce)

        if no_mask_ever:
            accumulate(None)
        else:
            start_row = (pl.program_id(0) * bps + inner) * block_rows
            is_full = start_row + block_rows <= n_rows

            @pl.when(is_full)                      # hot path: no mask ops at all
            def _fast():
                accumulate(None)

            @pl.when(jnp.logical_not(is_full))     # partial last block / ghost blocks
            def _masked():
                row = jax.lax.broadcasted_iota(jnp.int32, (block_rows, LANE), 0)
                accumulate((start_row + row) < n_rows)

        @pl.when(inner == pl.num_programs(1) - 1)
        def _finalize():
            for k in range(num_sums):
                out_ref[k:k + 1, :] = accs[k][...]

    return kernel


def _tail_sums(xt, yt, include_bce):
    """Plain-jnp sums for the < LANE leftover elements."""
    xt = xt.astype(jnp.float32)
    yt = yt.astype(jnp.float32)
    pos = xt > 0.0
    inter = jnp.sum(jnp.where(pos, yt, 0.0))
    psum = jnp.sum(pos.astype(jnp.float32))
    tsum = jnp.sum(yt)
    bsum = None
    if include_bce:
        bsum = jnp.sum(jnp.maximum(xt, 0.0) - xt * yt + jnp.log1p(jnp.exp(-jnp.abs(xt))))
    return inter, psum, tsum, bsum


def combined_loss(pred, target, weight_dice=1.0, weight_bce=0.0, smooth=1e-6):
    """Pallas TPU implementation of CombinedLoss.forward (weights are Python floats)."""
    include_bce = float(weight_bce) != 0.0
    num_sums = 4 if include_bce else 3

    n = pred.size
    x = pred.reshape(-1)      # native dtype — no wrapper-side upcast
    y = target.reshape(-1)

    n_rows = n // LANE
    main_n = n_rows * LANE

    zero = jnp.float32(0.0)
    inter = psum = tsum = bsum = zero

    if n_rows > 0:
        x_main = (x if main_n == n else x[:main_n]).reshape(n_rows, LANE)
        y_main = (y if main_n == n else y[:main_n]).reshape(n_rows, LANE)

        # Single block (== full dim, any row count) or 4096-row tiles.
        block_rows = n_rows if n_rows <= MAX_BLOCK_ROWS else MAX_BLOCK_ROWS
        total_blocks = pl.cdiv(n_rows, block_rows)
        num_shards = NUM_SHARDS if total_blocks >= NUM_SHARDS else 1
        bps = pl.cdiv(total_blocks, num_shards)        # inner (reduction) grid extent
        last_block = total_blocks - 1

        if num_shards * bps == total_blocks:
            def in_index_map(s, i):
                return (s * bps + i, 0)
        else:
            # Clamp ghost blocks to the last real block (in-bounds DMA); the kernel
            # masks their contribution to zero.
            def in_index_map(s, i):
                return (jnp.minimum(s * bps + i, last_block), 0)

        kernel = _make_sums_kernel(block_rows, n_rows, num_shards, bps,
                                   total_blocks, include_bce)

        in_bytes = x.dtype.itemsize + y.dtype.itemsize
        vmem_needed = 2 * block_rows * LANE * in_bytes      # 2 pipeline buffers / input
        vmem_limit = min(64 << 20, max(2 * vmem_needed, 32 << 20))
        cost = pl.CostEstimate(
            flops=(10 if include_bce else 6) * main_n,
            transcendentals=(2 * main_n) if include_bce else 0,
            bytes_accessed=main_n * in_bytes + num_shards * SUB * LANE * 4,
        )

        partials = pl.pallas_call(
            kernel,
            out_shape=jax.ShapeDtypeStruct((num_shards * SUB, LANE), jnp.float32),
            grid=(num_shards, bps),
            in_specs=[
                pl.BlockSpec((block_rows, LANE), in_index_map),
                pl.BlockSpec((block_rows, LANE), in_index_map),
            ],
            out_specs=pl.BlockSpec((SUB, LANE), lambda s, i: (s, 0)),
            scratch_shapes=[pltpu.VMEM((1, LANE), jnp.float32)] * num_sums,
            compiler_params=pltpu.CompilerParams(
                dimension_semantics=("parallel", "arbitrary"),
                vmem_limit_bytes=vmem_limit),
            cost_estimate=cost,
        )(x_main, y_main)

        sums = jnp.sum(partials.reshape(num_shards, SUB, LANE), axis=(0, 2))
        inter, psum, tsum = sums[0], sums[1], sums[2]
        if include_bce:
            bsum = sums[3]

    # TODO(synk): fold the <128-element lane tail into the kernel's masked last block
    # (lane-iota mask) to drop these extra tiny XLA dispatches for unaligned n.
    if main_n != n:
        ti, tp, tt, tb = _tail_sums(x[main_n:], y[main_n:], include_bce)
        inter = inter + ti
        psum = psum + tp
        tsum = tsum + tt
        if include_bce:
            bsum = bsum + tb

    dice = (2.0 * inter + smooth) / (psum + tsum + smooth)
    loss = weight_dice * (1.0 - dice)
    if include_bce:
        loss = loss + weight_bce * (bsum / jnp.float32(n))   # BCE mean reduction
    return loss


def _reference_loss(pred, target, weight_dice=1.0, weight_bce=0.0, smooth=1e-6):
    x = pred.reshape(-1).astype(jnp.float32)
    y = target.reshape(-1).astype(jnp.float32)
    bce = jnp.mean(jnp.maximum(x, 0.0) - x * y + jnp.log1p(jnp.exp(-jnp.abs(x))))
    pb = (jax.nn.sigmoid(x) > 0.5).astype(jnp.float32)
    dice = (2.0 * jnp.sum(pb * y) + smooth) / (jnp.sum(pb) + jnp.sum(y) + smooth)
    return weight_bce * bce + weight_dice * (1.0 - dice)


if __name__ == "__main__":
    key = jax.random.PRNGKey(0)
    k1, k2, k3, k4 = jax.random.split(key, 4)

    def check(loss, ref, tol=2e-5):
        l, r = float(loss), float(ref)
        assert abs(l - r) <= tol * max(1.0, abs(r)), (l, r)

    # 1) small NCHW logits/mask (single full block): default + mixed weights
    pred = jax.random.normal(k1, (2, 4, 16, 16), dtype=jnp.float32)
    target = (jax.random.uniform(k2, (2, 4, 16, 16)) > 0.5).astype(jnp.float32)
    l0 = combined_loss(pred, target, weight_dice=1.0, weight_bce=0.0)
    l1 = combined_loss(pred, target, weight_dice=0.7, weight_bce=0.3)
    jax.block_until_ready((l0, l1))
    check(l0, _reference_loss(pred, target, 1.0, 0.0))
    check(l1, _reference_loss(pred, target, 0.7, 0.3))

    # 2) bf16 logits (native-dtype path, no wrapper upcast)
    pred_bf16 = pred.astype(jnp.bfloat16)
    l2 = combined_loss(pred_bf16, target, weight_dice=0.7, weight_bce=0.3)
    jax.block_until_ready(l2)
    check(l2, _reference_loss(pred_bf16, target, 0.7, 0.3), tol=1e-4)

    # 3) multi-block, 2-shard grid: partial masked block, clamped ghost block, lane tail
    pred3 = jax.random.normal(k3, (2, 4, 360, 401), dtype=jnp.float32)
    target3 = (jax.random.uniform(k4, (2, 4, 360, 401)) > 0.5).astype(jnp.float32)
    l3 = combined_loss(pred3, target3, weight_dice=0.5, weight_bce=0.5)
    jax.block_until_ready(l3)
    check(l3, _reference_loss(pred3, target3, 0.5, 0.5), tol=5e-5)

    # 4) tiny input (< 128 elems): pure-jnp tail path only
    pred4 = jax.random.normal(k1, (1, 1, 5, 9), dtype=jnp.float32)
    target4 = (jax.random.uniform(k2, (1, 1, 5, 9)) > 0.5).astype(jnp.float32)
    l4 = combined_loss(pred4, target4, weight_dice=1.0, weight_bce=0.0)
    jax.block_until_ready(l4)
    check(l4, _reference_loss(pred4, target4, 1.0, 0.0))

    print("KERNEL_OK")
</pallas_src>

<mosaic_0001>
module attributes {stable_mosaic.version = 11 : i64} {
  func.func @kernel(%arg0: i32, %arg1: i32, %arg2: memref<16x128xf32, #tpu.memory_space<vmem>>, %arg3: memref<16x128xf32, #tpu.memory_space<vmem>>, %arg4: memref<8x128xf32, #tpu.memory_space<vmem>>, %arg5: memref<1x128xf32, #tpu.memory_space<vmem>>, %arg6: memref<1x128xf32, #tpu.memory_space<vmem>>, %arg7: memref<1x128xf32, #tpu.memory_space<vmem>>) attributes {dimension_semantics = [#tpu.dimension_semantics<parallel>, #tpu.dimension_semantics<arbitrary>], iteration_bounds = array<i64: 1, 1>, scalar_prefetch = 0 : i64, scratch_operands = 3 : i64, tpu.core_type = #tpu.core_type<tc>, window_params = [{transform_indices = @transform_0, window_bounds = array<i64: 16, 128>}, {transform_indices = @transform_1, window_bounds = array<i64: 16, 128>}, {transform_indices = @transform_2, window_bounds = array<i64: 8, 128>}]} {
    %c0_i32 = arith.constant 0 : i32
    %0 = arith.cmpi eq, %arg1, %c0_i32 : i32
    %1 = arith.extui %0 : i1 to i32
    %c0_i32_0 = arith.constant 0 : i32
    %2 = arith.cmpi ne, %1, %c0_i32_0 : i32
    scf.if %2 {
      %cst_22 = arith.constant 0.000000e+00 : f32
      %29 = vector.broadcast %cst_22 : f32 to vector<8x128xf32>
      %c0_23 = arith.constant 0 : index
      %c0_24 = arith.constant 0 : index
      %30 = vector.load %arg4[%c0_23, %c0_24] : memref<8x128xf32, #tpu.memory_space<vmem>>, vector<8x128xf32>
      tpu.vector_store %arg4[%c0_23, %c0_24], %29 {strides = array<i32>} : memref<8x128xf32, #tpu.memory_space<vmem>>, vector<8x128xf32>,
      %cst_25 = arith.constant 0.000000e+00 : f32
      %31 = vector.broadcast %cst_25 : f32 to vector<1x128xf32>
      %c0_26 = arith.constant 0 : index
      %c0_27 = arith.constant 0 : index
      %32 = vector.load %arg5[%c0_26, %c0_27] : memref<1x128xf32, #tpu.memory_space<vmem>>, vector<1x128xf32>
      tpu.vector_store %arg5[%c0_26, %c0_27], %31 {strides = array<i32>} : memref<1x128xf32, #tpu.memory_space<vmem>>, vector<1x128xf32>,
      %cst_28 = arith.constant 0.000000e+00 : f32
      %33 = vector.broadcast %cst_28 : f32 to vector<1x128xf32>
      %c0_29 = arith.constant 0 : index
      %c0_30 = arith.constant 0 : index
      %34 = vector.load %arg6[%c0_29, %c0_30] : memref<1x128xf32, #tpu.memory_space<vmem>>, vector<1x128xf32>
      tpu.vector_store %arg6[%c0_29, %c0_30], %33 {strides = array<i32>} : memref<1x128xf32, #tpu.memory_space<vmem>>, vector<1x128xf32>,
      %cst_31 = arith.constant 0.000000e+00 : f32
      %35 = vector.broadcast %cst_31 : f32 to vector<1x128xf32>
      %c0_32 = arith.constant 0 : index
      %c0_33 = arith.constant 0 : index
      %36 = vector.load %arg7[%c0_32, %c0_33] : memref<1x128xf32, #tpu.memory_space<vmem>>, vector<1x128xf32>
      tpu.vector_store %arg7[%c0_32, %c0_33], %35 {strides = array<i32>} : memref<1x128xf32, #tpu.memory_space<vmem>>, vector<1x128xf32>,
    } else {
    }
    %c0 = arith.constant 0 : index
    %c0_1 = arith.constant 0 : index
    %3 = vector.load %arg3[%c0, %c0_1] : memref<16x128xf32, #tpu.memory_space<vmem>>, vector<16x128xf32>
    %c0_2 = arith.constant 0 : index
    %c0_3 = arith.constant 0 : index
    %4 = vector.load %arg2[%c0_2, %c0_3] : memref<16x128xf32, #tpu.memory_space<vmem>>, vector<16x128xf32>
    %cst = arith.constant 0.000000e+00 : f32
    %5 = vector.broadcast %cst : f32 to vector<16x128xf32>
    %6 = arith.cmpf ogt, %4, %5 : vector<16x128xf32>
    %c0_4 = arith.constant 0 : index
    %c0_5 = arith.constant 0 : index
    %7 = vector.load %arg5[%c0_4, %c0_5] : memref<1x128xf32, #tpu.memory_space<vmem>>, vector<1x128xf32>
    %cst_6 = arith.constant 0.000000e+00 : f32
    %8 = vector.broadcast %cst_6 : f32 to vector<16x128xf32>
    %9 = arith.select %6, %3, %8 : vector<16x128xi1>, vector<16x128xf32>
    %cst_7 = arith.constant dense<0.000000e+00> : vector<128xf32>
    %10 = vector.multi_reduction <add>, %9, %cst_7 [0] : vector<16x128xf32> to vector<128xf32>
    %11 = vector.shape_cast %10 : vector<128xf32> to vector<1x128xf32>
    %12 = arith.addf %7, %11 : vector<1x128xf32>
    %c0_8 = arith.constant 0 : index
    %c0_9 = arith.constant 0 : index
    %13 = vector.load %arg5[%c0_8, %c0_9] : memref<1x128xf32, #tpu.memory_space<vmem>>, vector<1x128xf32>
    tpu.vector_store %arg5[%c0_8, %c0_9], %12 {strides = array<i32>} : memref<1x128xf32, #tpu.memory_space<vmem>>, vector<1x128xf32>,
    %c0_10 = arith.constant 0 : index
    %c0_11 = arith.constant 0 : index
    %14 = vector.load %arg6[%c0_10, %c0_11] : memref<1x128xf32, #tpu.memory_space<vmem>>, vector<1x128xf32>
    %15 = arith.extui %6 : vector<16x128xi1> to vector<16x128xi32>
    %16 = arith.sitofp %15 : vector<16x128xi32> to vector<16x128xf32>
    %cst_12 = arith.constant dense<0.000000e+00> : vector<128xf32>
    %17 = vector.multi_reduction <add>, %16, %cst_12 [0] : vector<16x128xf32> to vector<128xf32>
    %18 = vector.shape_cast %17 : vector<128xf32> to vector<1x128xf32>
    %19 = arith.addf %14, %18 : vector<1x128xf32>
    %c0_13 = arith.constant 0 : index
    %c0_14 = arith.constant 0 : index
    %20 = vector.load %arg6[%c0_13, %c0_14] : memref<1x128xf32, #tpu.memory_space<vmem>>, vector<1x128xf32>
    tpu.vector_store %arg6[%c0_13, %c0_14], %19 {strides = array<i32>} : memref<1x128xf32, #tpu.memory_space<vmem>>, vector<1x128xf32>,
    %c0_15 = arith.constant 0 : index
    %c0_16 = arith.constant 0 : index
    %21 = vector.load %arg7[%c0_15, %c0_16] : memref<1x128xf32, #tpu.memory_space<vmem>>, vector<1x128xf32>
    %cst_17 = arith.constant dense<0.000000e+00> : vector<128xf32>
    %22 = vector.multi_reduction <add>, %3, %cst_17 [0] : vector<16x128xf32> to vector<128xf32>
    %23 = vector.shape_cast %22 : vector<128xf32> to vector<1x128xf32>
    %24 = arith.addf %21, %23 : vector<1x128xf32>
    %c0_18 = arith.constant 0 : index
    %c0_19 = arith.constant 0 : index
    %25 = vector.load %arg7[%c0_18, %c0_19] : memref<1x128xf32, #tpu.memory_space<vmem>>, vector<1x128xf32>
    tpu.vector_store %arg7[%c0_18, %c0_19], %24 {strides = array<i32>} : memref<1x128xf32, #tpu.memory_space<vmem>>, vector<1x128xf32>,
    %c0_i32_20 = arith.constant 0 : i32
    %26 = arith.cmpi eq, %arg1, %c0_i32_20 : i32
    %27 = arith.extui %26 : i1 to i32
    %c0_i32_21 = arith.constant 0 : i32
    %28 = arith.cmpi ne, %27, %c0_i32_21 : i32
    scf.if %28 {
      %c0_22 = arith.constant 0 : index
      %c0_23 = arith.constant 0 : index
      %29 = vector.load %arg5[%c0_22, %c0_23] : memref<1x128xf32, #tpu.memory_space<vmem>>, vector<1x128xf32>
      %c0_24 = arith.constant 0 : index
      %c0_25 = arith.constant 0 : index
      %30 = vector.load %arg4[%c0_24, %c0_25] : memref<8x128xf32, #tpu.memory_space<vmem>>, vector<1x128xf32>
      tpu.vector_store %arg4[%c0_24, %c0_25], %29 {strides = array<i32>} : memref<8x128xf32, #tpu.memory_space<vmem>>, vector<1x128xf32>,
      %c0_26 = arith.constant 0 : index
      %c0_27 = arith.constant 0 : index
      %31 = vector.load %arg6[%c0_26, %c0_27] : memref<1x128xf32, #tpu.memory_space<vmem>>, vector<1x128xf32>
      %c1 = arith.constant 1 : index
      %c0_28 = arith.constant 0 : index
      %32 = vector.load %arg4[%c1, %c0_28] : memref<8x128xf32, #tpu.memory_space<vmem>>, vector<1x128xf32>
      tpu.vector_store %arg4[%c1, %c0_28], %31 {strides = array<i32>} : memref<8x128xf32, #tpu.memory_space<vmem>>, vector<1x128xf32>,
      %c0_29 = arith.constant 0 : index
      %c0_30 = arith.constant 0 : index
      %33 = vector.load %arg7[%c0_29, %c0_30] : memref<1x128xf32, #tpu.memory_space<vmem>>, vector<1x128xf32>
      %c2 = arith.constant 2 : index
      %c0_31 = arith.constant 0 : index
      %34 = vector.load %arg4[%c2, %c0_31] : memref<8x128xf32, #tpu.memory_space<vmem>>, vector<1x128xf32>
      tpu.vector_store %arg4[%c2, %c0_31], %33 {strides = array<i32>} : memref<8x128xf32, #tpu.memory_space<vmem>>, vector<1x128xf32>,
    } else {
    }
    return
  }
  func.func @transform_0(%arg0: i32, %arg1: i32) -> (i32, i32) {
    %c1_i32 = arith.constant 1 : i32
    %0 = arith.muli %arg0, %c1_i32 : i32
    %1 = arith.addi %0, %arg1 : i32
    %c0_i32 = arith.constant 0 : i32
    %c0_i32_0 = arith.constant 0 : i32
    return %1, %c0_i32 : i32, i32
  }
  func.func @transform_1(%arg0: i32, %arg1: i32) -> (i32, i32) {
    %c1_i32 = arith.constant 1 : i32
    %0 = arith.muli %arg0, %c1_i32 : i32
    %1 = arith.addi %0, %arg1 : i32
    %c0_i32 = arith.constant 0 : i32
    %c0_i32_0 = arith.constant 0 : i32
    return %1, %c0_i32 : i32, i32
  }
  func.func @transform_2(%arg0: i32, %arg1: i32) -> (i32, i32) {
    %c0_i32 = arith.constant 0 : i32
    %c0_i32_0 = arith.constant 0 : i32
    return %arg0, %c0_i32 : i32, i32
  }
}

</mosaic_0001>

<bundles_post_ra>
// kernel: tpu_custom_call.1
= control target key start
LH: loop header
LB: loop body
LE: loop exit
PB: predicated region body
PF: predicated region fallthrough
CT: control target
= control target key end

     0   :  { %7 = vsyncpa [#allocation6], 0  ;;  %s264_s0 = inlined_call_operand.hbm [shape: f32[16,128], index: 0, kind: input, shape index: {}]   ;;  %s265_s1 = inlined_call_operand.hbm [shape: f32[16,128], index: 1, kind: input, shape index: {}]   ;;  %s266_s2 = inlined_call_operand.hbm [shape: f32[8,128], index: 2, kind: output, shape index: {}]  }
   0x1   :  { %8 = vsyncpa [#allocation9], 0 }
   0x2   :  { %9 = vsyncpa [#allocation7], 0  ;;  %s207_s9 = smov [#allocation5]   ;;  %s135_s13 = scalar_lea.hbm %s264_s0, 256 }
   0x3   :  { %s19_s10 = sshll.u32 %s207_s9, 4  ;;  %p136_p0 = scmp.ne.s32.totalorder %s264_s0, %s135_s13  ;;  %s20_s10 = int_to_ptr.vmem [resolvable:$true] %s19_s10 }
   0x4   :  { %p139_p1 = scmp.lt.u32.totalorder %s135_s13, %s264_s0 }
   0x6   :  { %p141_p2 = pnand %p139_p1, %p136_p0 }
   0x8   :  { %144 = shalt.err (!%p141_p2)
}
   0x9   :  { %s145_s18 = scalar_lea.vmem %s20_s10, 256  ;;  %p150_p4 = scmp.lt.s32.totalorder %s20_s10, %s20_s10 }
   0xa   :  { %p146_p3 = scmp.ne.s32.totalorder %s20_s10, %s145_s18  ;;  %p151_p5 = scmp.lt.s32.totalorder %s145_s18, %s145_s18 }
   0xc   :  { %p152_p6 = por %p151_p5, %p150_p4 }
   0xe   :  { %p153_p7 = pnand %p152_p6, %p146_p3 }
  0x10   :  { %156 = shalt.err (!%p153_p7)
}
  0x11   :  { %s208_s19 = smov 128   ;;  %s209_s20 = smov 8  }
  0x12   :  { %25 = dma.hbm_to_vmem [thread:$0]  %s264_s0, 256, %s20_s10, [#allocation6], %s208_s19, %s208_s19, %s209_s20  }
  0x13   :  { %s210_s23 = smov [#allocation8]   ;;  %s157_s27 = scalar_lea.hbm %s265_s1, 256 }
  0x14   :  { %s35_s24 = sshll.u32 %s210_s23, 4  ;;  %p158_p8 = scmp.ne.s32.totalorder %s265_s1, %s157_s27  ;;  %s36_s24 = int_to_ptr.vmem [resolvable:$true] %s35_s24 }
  0x15   :  { %p161_p9 = scmp.lt.u32.totalorder %s157_s27, %s265_s1 }
  0x17   :  { %p163_p10 = pnand %p161_p9, %p158_p8 }
  0x19   :  { %166 = shalt.err (!%p163_p10)
}
  0x1a   :  { %s167_s4 = scalar_lea.vmem %s36_s24, 256  ;;  %p172_p12 = scmp.lt.s32.totalorder %s36_s24, %s36_s24 }
  0x1b   :  { %p168_p11 = scmp.ne.s32.totalorder %s36_s24, %s167_s4  ;;  %p173_p13 = scmp.lt.s32.totalorder %s167_s4, %s167_s4 }
  0x1d   :  { %p174_p0 = por %p173_p13, %p172_p12 }
  0x1f   :  { %p175_p1 = pnand %p174_p0, %p168_p11 }
  0x21   :  { %178 = shalt.err (!%p175_p1)
}
  0x22   :  { %41 = dma.hbm_to_vmem [thread:$0]  %s265_s1, 256, %s36_s24, [#allocation9], %s208_s19, %s208_s19, %s209_s20  }
  0x23   :  { %201 = dma.done.wait [#allocation6], 256  }
  0x24   :  { %202 = vsyncadd [#allocation6], 4294967040 }
  0x25   :  { %203 = dma.done.wait [#allocation9], 256  }
  0x26   :  { %204 = vsyncadd [#allocation9], 4294967040  ;;  %v211_v0 = vmov 0.0   ;;  %v60_v1 = vld [vmem:[#allocation8] sm:$0xff]  ;;  %v61_v2 = vld [vmem:[#allocation8 + $0x8] sm:$0xff]  ;;  %s212_s1 = smov [#allocation10]  }
  0x27   :  { %57 = vst [vmem:[#allocation2] sm:$0x1] %v211_v0  ;;  %56 = vst [vmem:[#allocation10] sm:$0xff] %v211_v0  ;;  %v62_v3 = vld [vmem:[#allocation5] sm:$0xff]  ;;  %v63_v4 = vld [vmem:[#allocation5 + $0x8] sm:$0xff]  ;;  %v93_v5 = vadd.f32 %v61_v2, %v60_v1  ;;  %s117_s6 = sshll.u32 %s212_s1, 4  ;;  %s118_s6 = int_to_ptr.vmem [resolvable:$true] %s117_s6 }
  0x28   :  { %58 = vst [vmem:[#allocation3] sm:$0x1] %v211_v0  ;;  %59 = vst [vmem:[#allocation4] sm:$0x1] %v211_v0  ;;  %vm64_vm0 = vcmp.gt.f32.partialorder %v62_v3, 0.0  ;;  %vm65_vm1 = vcmp.gt.f32.partialorder %v63_v4, 0.0  ;;  %p184_p3 = scmp.lt.s32.totalorder %s118_s6, %s118_s6 }
  0x29   :  { %v67_v6 = vsel %vm64_vm0, %v60_v1, 0.0  ;;  %v127_v7 = vsel %vm64_vm0, 1.0, %v211_v0  ;;  %v68_v8 = vsel %vm65_vm1, %v61_v2, 0.0  ;;  %v128_v9 = vsel %vm65_vm1, 1.0, %v211_v0  ;;  %s179_s7 = scalar_lea.vmem %s118_s6, 128 }
  0x2a   :  { %v94_v10 = vrot.slane %v93_v5, 4  ;;  %v69_v11 = vadd.f32 %v68_v8, %v67_v6  ;;  %v83_v12 = vadd.f32 %v128_v9, %v127_v7  ;;  %p180_p2 = scmp.ne.s32.totalorder %s118_s6, %s179_s7  ;;  %p185_p4 = scmp.lt.s32.totalorder %s179_s7, %s179_s7 }
  0x2c   :  { %v95_v13 = vadd.f32 %v94_v10, %v93_v5  ;;  %v70_v14 = vrot.slane %v69_v11, 4  ;;  %v84_v15 = vrot.slane %v83_v12, 4  ;;  %p186_p5 = por %p185_p4, %p184_p3 }
  0x2e   :  { %v96_v16 = vrot.slane %v95_v13, 2  ;;  %v71_v17 = vadd.f32 %v70_v14, %v69_v11  ;;  %v85_v18 = vadd.f32 %v84_v15, %v83_v12  ;;  %v66_v29 = vld [vmem:[#allocation2] sm:$0x1]  ;;  %p187_p6 = pnand %p186_p5, %p180_p2 }
  0x2f   :  { %v92_v25 = vld [vmem:[#allocation4] sm:$0x1]  ;;  %v78_v30 = vld [vmem:[#allocation3] sm:$0x1] }
  0x30   :  { %v97_v19 = vadd.f32 %v96_v16, %v95_v13  ;;  %v72_v20 = vrot.slane %v71_v17, 2  ;;  %v86_v21 = vrot.slane %v85_v18, 2 }
  0x32   :  { %v98_v22 = vrot.slane %v97_v19, 1  ;;  %v73_v23 = vadd.f32 %v72_v20, %v71_v17  ;;  %v87_v24 = vadd.f32 %v86_v21, %v85_v18 }
  0x34   :  { %v99_v26 = vadd.f32 %v98_v22, %v97_v19  ;;  %v74_v27 = vrot.slane %v73_v23, 1  ;;  %v88_v28 = vrot.slane %v87_v24, 1 }
  0x36   :  { %v100_v31 = vadd.f32 %v99_v26, %v92_v25  ;;  %v75_v32 = vadd.f32 %v74_v27, %v73_v23  ;;  %v89_v33 = vadd.f32 %v88_v28, %v87_v24 }
  0x38   :  { %101 = vst [vmem:[#allocation4] sm:$0x1] %v100_v31  ;;  %v76_v34 = vadd.f32 %v75_v32, %v66_v29  ;;  %v90_v35 = vadd.f32 %v89_v33, %v78_v30 }
  0x3a   :  { %77 = vst [vmem:[#allocation2] sm:$0x1] %v76_v34  ;;  %91 = vst [vmem:[#allocation3] sm:$0x1] %v90_v35 }
  0x3f   :  { %v109_v36 = vld [vmem:[#allocation4] sm:$0x1] }
  0x40   :  { %110 = vst [vmem:[#allocation10 + $0x2] sm:$0x1] %v109_v36 }
  0x41   :  { %v105_v37 = vld [vmem:[#allocation2] sm:$0x1]  ;;  %v107_v38 = vld [vmem:[#allocation3] sm:$0x1] }
  0x42   :  { %106 = vst [vmem:[#allocation10] sm:$0x1] %v105_v37  ;;  %108 = vst [vmem:[#allocation10 + $0x1] sm:$0x1] %v107_v38 }
  0x43   :  { %190 = shalt.err (!%p187_p6)
}
  0x44   :  { %s191_s10 = scalar_lea.hbm %s266_s2, 128 }
  0x45   :  { %p192_p7 = scmp.ne.s32.totalorder %s266_s2, %s191_s10  ;;  %p195_p8 = scmp.lt.u32.totalorder %s191_s10, %s266_s2 }
  0x47   :  { %p197_p9 = pnand %p195_p8, %p192_p7 }
  0x49   :  { %200 = shalt.err (!%p197_p9)
}
  0x4a   :  { %120 = dma.vmem_to_hbm [thread:$0]  %s118_s6, 128, %s266_s2, [#allocation7]  }
  0x4b   :  { %205 = dma.done.wait [#allocation7], 128  }
  0x4c   :  { %206 = vsyncadd [#allocation7], 4294967168 }
  0x4d   :  { %124 = vsyncpa [#allocation6], 1 }
  0x4e   :  { %125 = vsyncpa [#allocation9], 1 }
  0x4f   :  { %126 = vsyncpa [#allocation7], 1 }

</bundles_post_ra>
